<compile_context>
chip_gen: v7x
topology: tpu7x:2x2x1
jax: 0.10.0
libtpu: 0.0.40
codegen_flags: <defaults>
</compile_context>

<pallas_src>
import math

import jax
import jax.numpy as jnp
from jax.experimental import pallas as pl
from jax.experimental.pallas import tpu as pltpu


def _eca_kernel(w_ref, x_ref, o_ref):
    """w_ref: (k,) SMEM scalars (1/(H*W) pooling scale folded in).
    x_ref / o_ref: (Bt, C, H*W) lane-dense VMEM tiles."""
    Bt, C, HW = x_ref.shape

    # Global average pool as a spatial sum (scale lives in the taps).
    # Up-cast only inside the reduction; no tile-sized f32 copy is kept live.
    pooled = jnp.sum(x_ref[...].astype(jnp.float32), axis=2)      # (Bt, C)

    # k-tap 1D conv (cross-correlation) along channels with zero padding:
    #   gate[b, c] = sum_j w[j] * pooled[b, c + j - pad]
    k = w_ref.shape[0]
    pad = (k - 1) // 2
    cidx = jax.lax.broadcasted_iota(jnp.int32, (Bt, C), 1)
    gate = jnp.zeros((Bt, C), jnp.float32)
    for j in range(k):
        s = j - pad
        if s == 0:
            shifted = pooled
        else:
            # out[c] = pooled[(c + s) mod C]  (cheap XLU lane rotation),
            # then mask off the wrapped-around (zero-padded) taps.
            shifted = pltpu.roll(pooled, shift=(-s) % C, axis=1)
            valid = (cidx + s >= 0) & (cidx + s < C)
            shifted = jnp.where(valid, shifted, 0.0)
        gate = gate + w_ref[j] * shifted
    gate = jax.nn.sigmoid(gate)                                   # (Bt, C)

    # Broadcast-multiply over the spatial (lane) axis in the native dtype:
    # re-read x_ref here instead of keeping an up-cast copy alive.
    o_ref[...] = x_ref[...] * gate.astype(o_ref.dtype)[:, :, None]


def _vmem_limit_bytes():
    """~75% of physical VMEM, capped at 100 MiB.
    -> ~96 MiB on v5e/v6e (128 MiB physical), ~48 MiB on v7x (64 MiB/TC)."""
    try:
        cap = int(pltpu.get_tpu_info().vmem_capacity_bytes)
    except Exception:
        cap = 64 * 1024 * 1024          # conservative fallback (v7x per-core)
    return min((cap * 3) // 4, 100 * 1024 * 1024)


def _padded_per_batch_bytes(C, HW, itemsize):
    """Bytes of one (1, C, HW) block after TPU layout padding:
    lanes to multiples of 128, sublanes to the dtype tile (8/f32, 16/bf16)."""
    sublane_tile = 8 * (4 // itemsize)            # 8 for f32, 16 bf16, 32 int8
    c_pad = ((C + sublane_tile - 1) // sublane_tile) * sublane_tile
    hw_pad = ((HW + 127) // 128) * 128
    return c_pad * hw_pad * itemsize


def _pick_batch_tile(B, per_batch_bytes, budget_bytes):
    """Largest divisor of B whose double-buffered in+out blocks fit the budget,
    preferring (1) an even number of grid steps (clean 2-TensorCore split on
    v7x), then (2) at least two steps when B >= 2, then (3) the biggest tile."""
    # in block + out block, each double-buffered -> 4 copies of the tile
    max_bt = max(1, budget_bytes // (4 * per_batch_bytes))
    max_bt = min(max_bt, B)
    divisors = [d for d in range(1, B + 1) if B % d == 0 and d <= max_bt]

    def score(d):
        steps = B // d
        return ((steps % 2 == 0), steps >= 2 or B < 2, d)

    return max(divisors, key=score)


def eca_block(x, conv_w):
    """x: (B, C, H, W).  conv_w: (k,) Conv1d weight (no bias)."""
    B, C, H, W = x.shape
    HW = H * W
    k = int(conv_w.shape[0])
    itemsize = jnp.dtype(x.dtype).itemsize

    # Lane-dense view of the activations (cheap contiguous reshape).
    x2 = x.reshape(B, C, HW)
    # Fold the average-pool scale into the k conv taps (SMEM scalars).
    w_scaled = conv_w.astype(jnp.float32) / float(HW)

    vmem_limit = _vmem_limit_bytes()
    # Leave a small margin inside the limit for compiler-internal scratch.
    tile_budget = max(vmem_limit - (2 * 1024 * 1024), 4 * 1024 * 1024)
    per_batch_bytes = _padded_per_batch_bytes(C, HW, itemsize)
    Bt = _pick_batch_tile(B, per_batch_bytes, tile_budget)
    grid = (B // Bt,)

    out = pl.pallas_call(
        _eca_kernel,
        out_shape=jax.ShapeDtypeStruct((B, C, HW), x.dtype),
        grid_spec=pltpu.PrefetchScalarGridSpec(
            num_scalar_prefetch=0,
            grid=grid,
            in_specs=[
                pl.BlockSpec(memory_space=pltpu.MemorySpace.SMEM),   # conv taps
                pl.BlockSpec((Bt, C, HW), lambda b: (b, 0, 0)),      # x tile
            ],
            out_specs=pl.BlockSpec((Bt, C, HW), lambda b: (b, 0, 0)),
        ),
        compiler_params=pltpu.CompilerParams(
            dimension_semantics=("parallel",),
            vmem_limit_bytes=vmem_limit,
        ),
        cost_estimate=pl.CostEstimate(
            flops=2 * B * C * HW + 2 * B * C * k,
            transcendentals=B * C,
            bytes_accessed=2 * B * C * HW * itemsize + k * 4,
        ),
    )(w_scaled, x2)
    return out.reshape(B, C, H, W)


def _reference(x, conv_w):
    """Plain-JAX reference matching the PyTorch forward exactly."""
    B, C, H, W = x.shape
    k = conv_w.shape[0]
    pad = (k - 1) // 2
    pooled = jnp.mean(x.astype(jnp.float32), axis=(2, 3))  # (B, C)
    pooled_p = jnp.pad(pooled, ((0, 0), (pad, pad)))
    gate = jnp.zeros((B, C), dtype=jnp.float32)
    for j in range(k):
        gate = gate + conv_w[j] * pooled_p[:, j:j + C]
    gate = jax.nn.sigmoid(gate)
    return (x * gate[:, :, None, None]).astype(x.dtype)


if __name__ == "__main__":
    key = jax.random.PRNGKey(0)
    B, C, H, W = 2, 16, 16, 16

    # kernel_size derivation copied from eca_block.__init__ (C=16 -> k=3)
    k = int(abs((math.log(C, 2) + 1) / 2))
    k = k if k % 2 else k + 1

    kx, kw = jax.random.split(key)
    x = jax.random.normal(kx, (B, C, H, W), dtype=jnp.float32)
    conv_w = 0.5 * jax.random.normal(kw, (k,), dtype=jnp.float32)

    out = eca_block(x, conv_w)
    out = jax.block_until_ready(out)

    ref = _reference(x, conv_w)
    assert out.shape == x.shape and out.dtype == x.dtype
    assert jnp.allclose(out, ref, atol=1e-5, rtol=1e-5)

    print("KERNEL_OK")
</pallas_src>

<mosaic_0001>
module attributes {stable_mosaic.version = 11 : i64} {
  func.func @_eca_kernel(%arg0: i32, %arg1: memref<3xf32, #tpu.memory_space<smem>>, %arg2: memref<1x16x256xf32, #tpu.memory_space<vmem>>, %arg3: memref<1x16x256xf32, #tpu.memory_space<vmem>>) attributes {dimension_semantics = [#tpu.dimension_semantics<parallel>], iteration_bounds = array<i64: 2>, scalar_prefetch = 0 : i64, scratch_operands = 0 : i64, tpu.core_type = #tpu.core_type<tc>, window_params = [{transform_indices = @transform_0, window_bounds = array<i64: 3>}, {transform_indices = @transform_1, window_bounds = array<i64: 1, 16, 256>}, {transform_indices = @transform_2, window_bounds = array<i64: 1, 16, 256>}]} {
    %c0 = arith.constant 0 : index
    %c0_0 = arith.constant 0 : index
    %c0_1 = arith.constant 0 : index
    %0 = vector.load %arg2[%c0, %c0_0, %c0_1] : memref<1x16x256xf32, #tpu.memory_space<vmem>>, vector<1x16x256xf32>
    %cst = arith.constant dense<0.000000e+00> : vector<1x16xf32>
    %1 = vector.multi_reduction <add>, %0, %cst [2] : vector<1x16x256xf32> to vector<1x16xf32>
    %2 = tpu.iota {dimensions = array<i32: 1>} : vector<1x16xi32>
    %cst_2 = arith.constant 0.000000e+00 : f32
    %3 = vector.broadcast %cst_2 : f32 to vector<1x16xf32>
    %c1_i32 = arith.constant 1 : i32
    %4 = tpu.dynamic_rotate %1 by %c1_i32 dim 1 : vector<1x16xf32>, i32 -> vector<1x16xf32>
    %c-1_i32 = arith.constant -1 : i32
    %5 = vector.broadcast %c-1_i32 : i32 to vector<1x16xi32>
    %6 = arith.addi %2, %5 : vector<1x16xi32>
    %c0_i32 = arith.constant 0 : i32
    %7 = vector.broadcast %c0_i32 : i32 to vector<1x16xi32>
    %8 = arith.cmpi sge, %6, %7 : vector<1x16xi32>
    %c-1_i32_3 = arith.constant -1 : i32
    %9 = vector.broadcast %c-1_i32_3 : i32 to vector<1x16xi32>
    %10 = arith.addi %2, %9 : vector<1x16xi32>
    %c16_i32 = arith.constant 16 : i32
    %11 = vector.broadcast %c16_i32 : i32 to vector<1x16xi32>
    %12 = arith.cmpi slt, %10, %11 : vector<1x16xi32>
    %13 = arith.andi %8, %12 : vector<1x16xi1>
    %cst_4 = arith.constant 0.000000e+00 : f32
    %14 = vector.broadcast %cst_4 : f32 to vector<1x16xf32>
    %15 = arith.select %13, %4, %14 : vector<1x16xi1>, vector<1x16xf32>
    %c0_5 = arith.constant 0 : index
    %16 = memref.load %arg1[%c0_5] : memref<3xf32, #tpu.memory_space<smem>>
    %17 = vector.broadcast %16 : f32 to vector<1x16xf32>
    %18 = arith.mulf %17, %15 : vector<1x16xf32>
    %19 = arith.addf %3, %18 : vector<1x16xf32>
    %c1 = arith.constant 1 : index
    %20 = memref.load %arg1[%c1] : memref<3xf32, #tpu.memory_space<smem>>
    %21 = vector.broadcast %20 : f32 to vector<1x16xf32>
    %22 = arith.mulf %21, %1 : vector<1x16xf32>
    %23 = arith.addf %19, %22 : vector<1x16xf32>
    %c15_i32 = arith.constant 15 : i32
    %24 = tpu.dynamic_rotate %1 by %c15_i32 dim 1 : vector<1x16xf32>, i32 -> vector<1x16xf32>
    %c1_i32_6 = arith.constant 1 : i32
    %25 = vector.broadcast %c1_i32_6 : i32 to vector<1x16xi32>
    %26 = arith.addi %2, %25 : vector<1x16xi32>
    %c0_i32_7 = arith.constant 0 : i32
    %27 = vector.broadcast %c0_i32_7 : i32 to vector<1x16xi32>
    %28 = arith.cmpi sge, %26, %27 : vector<1x16xi32>
    %c1_i32_8 = arith.constant 1 : i32
    %29 = vector.broadcast %c1_i32_8 : i32 to vector<1x16xi32>
    %30 = arith.addi %2, %29 : vector<1x16xi32>
    %c16_i32_9 = arith.constant 16 : i32
    %31 = vector.broadcast %c16_i32_9 : i32 to vector<1x16xi32>
    %32 = arith.cmpi slt, %30, %31 : vector<1x16xi32>
    %33 = arith.andi %28, %32 : vector<1x16xi1>
    %cst_10 = arith.constant 0.000000e+00 : f32
    %34 = vector.broadcast %cst_10 : f32 to vector<1x16xf32>
    %35 = arith.select %33, %24, %34 : vector<1x16xi1>, vector<1x16xf32>
    %c2 = arith.constant 2 : index
    %36 = memref.load %arg1[%c2] : memref<3xf32, #tpu.memory_space<smem>>
    %37 = vector.broadcast %36 : f32 to vector<1x16xf32>
    %38 = arith.mulf %37, %35 : vector<1x16xf32>
    %39 = arith.addf %23, %38 : vector<1x16xf32>
    %40 = arith.negf %39 : vector<1x16xf32>
    %41 = math.exp %40 : vector<1x16xf32>
    %cst_11 = arith.constant 1.000000e+00 : f32
    %42 = vector.broadcast %cst_11 : f32 to vector<1x16xf32>
    %43 = arith.addf %42, %41 : vector<1x16xf32>
    %44 = arith.divf %42, %43 : vector<1x16xf32>
    %c0_12 = arith.constant 0 : index
    %c0_13 = arith.constant 0 : index
    %c0_14 = arith.constant 0 : index
    %45 = vector.load %arg2[%c0_12, %c0_13, %c0_14] : memref<1x16x256xf32, #tpu.memory_space<vmem>>, vector<1x16x256xf32>
    %46 = vector.shape_cast %44 : vector<1x16xf32> to vector<1x16x1xf32>
    %47 = vector.broadcast %46 : vector<1x16x1xf32> to vector<1x16x256xf32>
    %48 = arith.mulf %45, %47 : vector<1x16x256xf32>
    %c0_15 = arith.constant 0 : index
    %c0_16 = arith.constant 0 : index
    %c0_17 = arith.constant 0 : index
    %49 = vector.load %arg3[%c0_15, %c0_16, %c0_17] : memref<1x16x256xf32, #tpu.memory_space<vmem>>, vector<1x16x256xf32>
    tpu.vector_store %arg3[%c0_15, %c0_16, %c0_17], %48 {strides = array<i32>} : memref<1x16x256xf32, #tpu.memory_space<vmem>>, vector<1x16x256xf32>,
    return
  }
  func.func @transform_0(%arg0: i32) -> i32 {
    %c0_i32 = arith.constant 0 : i32
    %c0_i32_0 = arith.constant 0 : i32
    return %c0_i32 : i32
  }
  func.func @transform_1(%arg0: i32) -> (i32, i32, i32) {
    %c0_i32 = arith.constant 0 : i32
    %c0_i32_0 = arith.constant 0 : i32
    %c0_i32_1 = arith.constant 0 : i32
    return %arg0, %c0_i32, %c0_i32_0 : i32, i32, i32
  }
  func.func @transform_2(%arg0: i32) -> (i32, i32, i32) {
    %c0_i32 = arith.constant 0 : i32
    %c0_i32_0 = arith.constant 0 : i32
    %c0_i32_1 = arith.constant 0 : i32
    return %arg0, %c0_i32, %c0_i32_0 : i32, i32, i32
  }
}

</mosaic_0001>

<bundles_post_ra>
// kernel: tpu_custom_call.1
= control target key start
LH: loop header
LB: loop body
LE: loop exit
PB: predicated region body
PF: predicated region fallthrough
CT: control target
= control target key end

     0   :  { %7 = vsyncpa [#allocation5], 0  ;;  %s813_s0 = inlined_call_operand.hbm [shape: f32[3], index: 0, kind: input, shape index: {}]   ;;  %s814_s1 = inlined_call_operand.hbm [shape: f32[2,16,256], index: 1, kind: input, shape index: {}]   ;;  %s815_s2 = inlined_call_operand.hbm [shape: f32[2,16,256], index: 2, kind: output, shape index: {}]  }
   0x1   :  { %8 = vsyncpa [#allocation3], 0 }
   0x2   :  { %10 = vsyncpa [#allocation3 + $0x1], 0 }
   0x3   :  { %11 = vsyncpa [#allocation4], 0 }
   0x4   :  { %13 = vsyncpa [#allocation4 + $0x1], 0  ;;  %s600_s9 = smov 0   ;;  %s602_s10 = smov 0  }
   0x5   :  { %s604_s11 = smov 0   ;;  %s606_s12 = smov 0  }
   0x6 LB: > { %s621_s13 = sadd.s32 4294967295, %s574_s12   ;;  %s373_s14 = sadd.s32 4294967294, %s574_s12   ;;  %s574_s12 = sphi %s606_s12, %s835_s12   ;;  %s570_s11 = sphi %s604_s11, %s834_s11   ;;  %s566_s10 = sphi %s602_s10, %s833_s10   ;;  %s562_s9 = sphi %s600_s9, %s832_s9  }
   0x7   : > { %s625_s15 = sadd.s32 1, %s574_s12   ;;  %s47_s16 = sadd.s32 1, %s570_s11 }
   0x8   : > { %s44_s17 = ssub.s32 %s574_s12, %s625_s15  ;;  %p54_p0 = scmp.ne.s32.totalorder %s570_s11, %s566_s10 }
   0x9   : > { %p45_p1 = scmp.eq.s32.totalorder %s44_s17, 0  ;;  %p55_p2 = scmp.eq.s32.totalorder %s574_s12, 0 }
   0xa   : > { %p60_p3 = scmp.ne.s32.totalorder %s566_s10, %s562_s9  ;;  %p816_p4 = scmp.eq.s32.totalorder %s621_s13, 0 }
   0xb   : > { %s637_s18 = scalar_select %p45_p1, %s570_s11, %s47_s16  }
   0xc   : > { %p639_p5 = por %p55_p2, %p54_p0  ;;  %p645_p6 = por %p816_p4, %p60_p3 }
   0xd   : > { %p84_p7 = scmp.eq.s32.totalorder %s621_s13, 1  ;;  %p90_p8 = scmp.eq.s32.totalorder %s373_s14, 1 }
   0xe   : > { %s820_s20 = scalar_select %p645_p6, 1, 0 }
   0xf   : > { %p374_p9 = scmp.ge.s32.totalorder %s574_s12, 1  ;;  %p97_p10 = scmp.lt.s32.totalorder %s574_s12, 3 }
  0x10   : > { %p652_p11 = por %p84_p7, %p54_p0  ;;  %p656_p12 = por %p90_p8, %p60_p3 }
  0x11   : > { %p660_p13 = pnand %p374_p9, %p97_p10  ;;  %p415_p4 = scmp.lt.s32.totalorder %s574_s12, 2 }
  0x12   : > { %s821_s21 = scalar_select %p652_p11, 1, 0 }
  0x13   : > { %s822_s22 = scalar_select %p656_p12, 1, 0 }
  0x14   : > { %p402_p2 = pneg %p660_p13  ;;  %s119_s24 = sand.u32 1, %s570_s11  }
  0x15   : > { %s392_s25 = sshll.u32 %s574_s12, 9  ;;  %p824_p6 = scmp.eq.s32.totalorder %s621_s13, 0 }
  0x16   : > { %p674_p7 = pnand %p415_p4, %p639_p5  ;;  %s377_s27 = sshll.u32 %s119_s24, 5 }
  0x17   : > { %p403_p0 = pnand %p402_p2, %p824_p6  ;;  %s461_s30 = scalar_lea.hbm %s813_s0, 16 }
  0x18   : > { %p462_p3 = scmp.ne.s32.totalorder %s813_s0, %s461_s30  ;;  %p468_p6 = scmp.lt.u32.totalorder %s461_s30, %s813_s0 }
  0x19   : > { %p463_p8 = pneg %p403_p0 }
  0x1b   : > { %p464_p9 = pnand %p463_p8, %p462_p3 }
  0x1d   : > { %p465_p10 = pneg %p464_p9 }
  0x1f   : > { %p470_p4 = pnand %p468_p6, %p465_p10 }
  0x21   : > { %473 = shalt.err (!%p470_p4)
}
  0x22   : > { %s576_s7 = smov [#allocation2]   ;;  %s693_s19 = scalar_lea.hbm %s814_s1, %s392_s25 }
  0x23   : > { %405 = dma.hbm_to_smem (!%p403_p0), %s813_s0, 16, %s576_s7, [#allocation5]  }
  0x24   : > { %s123_s28 = scalar_lea.vmem [#allocation6], %s377_s27  ;;  %s697_s30 = scalar_lea.sflag [#allocation3], %s119_s24 }
  0x25   : > { %s130_s29 = sshll.u32 %s123_s28, 4  ;;  %s474_s3 = scalar_lea.hbm %s693_s19, 512  ;;  %s695_s29 = int_to_ptr.vmem [resolvable:$true] %s130_s29 }
  0x26   : > { %p475_p5 = scmp.ne.s32.totalorder %s693_s19, %s474_s3  ;;  %p476_p2 = pneg %p674_p7 }
  0x27   : > { %s479_s5 = scalar_lea.hbm %s814_s1, 1024  ;;  %p480_p8 = scmp.lt.u32.totalorder %s693_s19, %s814_s1 }
  0x28   : > { %p477_p0 = pnand %p476_p2, %p475_p5  ;;  %p481_p9 = scmp.lt.u32.totalorder %s479_s5, %s474_s3 }
  0x29   : > { %p483_p6 = scmp.lt.u32.totalorder %s474_s3, %s693_s19 }
  0x2a   : > { %p478_p3 = pneg %p477_p0  ;;  %p482_p10 = por %p481_p9, %p480_p8 }
  0x2c   : > { %p484_p4 = por %p483_p6, %p482_p10 }
  0x2e   : > { %p485_p1 = pnand %p484_p4, %p478_p3 }
  0x30   : > { %488 = shalt.err (!%p485_p1)
}
  0x31   : > { %s489_s24 = scalar_lea.vmem %s695_s29, 512  ;;  %s577_s27 = smov [#allocation6]  }
  0x32   : > { %p490_p5 = scmp.ne.s32.totalorder %s695_s29, %s489_s24  ;;  %s494_s8 = sshll.u32 %s577_s27, 4  ;;  %s495_s8 = int_to_ptr.vmem [resolvable:$false] %s494_s8 }
  0x33   : > { %s496_s14 = scalar_lea.vmem %s495_s8, 1024  ;;  %p497_p11 = scmp.lt.s32.totalorder %s695_s29, %s495_s8 }
  0x34   : > { %p492_p0 = pnand %p490_p5, %p476_p2  ;;  %p498_p8 = scmp.lt.s32.totalorder %s496_s14, %s489_s24 }
  0x36   : > { %p493_p12 = pneg %p492_p0  ;;  %p499_p9 = por %p498_p8, %p497_p11 }
  0x38   : > { %p500_p10 = pnand %p499_p9, %p493_p12 }
  0x3a   : > { %503 = shalt.err (!%p500_p10)
}
  0x3b   : > { %s578_s16 = smov 256   ;;  %s579_s17 = smov 16  }
  0x3c   : > { %409 = dma.hbm_to_vmem [thread:$0]  (!%p674_p7), %s693_s19, 512, %s695_s29, %s697_s30, %s578_s16, %s578_s16, %s579_s17  }
  0x3d   : > { %142 = sbr.rel (%p660_p13) target bundleno = 745 (0x2e9), region = 28  ;;  %p826_p1 = scmp.eq.s32.totalorder (!%p660_p13), %s621_s13, 0 }
  0x44   : > { %549 = dma.done.wait (%p826_p1), [#allocation5], 16   ;;  %p827_p2 = pmov %p826_p1 }
  0x45   : > { %s732_s28 = sand.u32 1, %s566_s10   ;;  %p828_p11 = scmp.ne.s32.totalorder %s820_s20, 0 }
  0x46   : > { %551 = vsyncadd (%p827_p2), [#allocation5], 4294967280  ;;  %s382_s3 = sshll.u32 %s732_s28, 5  ;;  %s149_s25 = scalar_lea.sflag [#allocation3], %s732_s28 }
  0x47   : > { %s152_s26 = scalar_lea.vmem [#allocation6], %s382_s3 }
  0x48   : > { %553 = dma.done.wait (%p828_p11), %s149_s25, 512  }
  0x49   : > { %555 = vsyncadd (%p828_p11), %s149_s25, 4294966784 }
  0x4a   : > { %157 = sfence }
  0x4b   : > { %v742_v0 = vld [vmem:[%s152_s26] sm:$0xff]  ;;  %v744_v1 = vld [vmem:[%s152_s26 + $0x8] sm:$0xff]  ;;  %v746_v2 = vld [vmem:[%s152_s26 + $0x10] sm:$0xff]  ;;  %s384_s23 = sld [smem:[#allocation2 + $0x1]]  ;;  %v184_v6 = vlaneseq  ;;  %vm197_vm0 = vcmask 130112   ;;  %s580_s20 = smov 16  }
  0x4c   : > { %v178_v3 = vadd.f32 %v744_v1, %v742_v0  ;;  %v750_v4 = vld [vmem:[%s152_s26 + $0x18] sm:$0xff]  ;;  %vm200_vm1 = vcmask 1047680   ;;  %s581_s19 = smov 127   ;;  %s582_s29 = smov 113  }
  0x4d   : > { %v181_v5 = vadd.f32 %v750_v4, %v746_v2  ;;  %v185_v7 = vand.u32 127, %v184_v6  ;;  %v189_v8 = vshrl.u32 %v184_v6, 7  ;;  %s216_s30 = sld [smem:[#allocation2]]  ;;  %s385_s4 = sld [smem:[#allocation2 + $0x2]] }
  0x4e   : > { %179 = vadd.xlane.f32.xlu0 %v178_v3  ;;  %s173_s5 = scalar_lea.vmem [#allocation7], %s382_s3  ;;  %s393_s7 = sshll.u32 %s621_s13, 9 }
  0x4f   : > { %v192_v9 = vadd.s32 4294967288, %v185_v7  ;;  %v190_v12 = vsub.s32 %v185_v7, %v189_v8  ;;  %v207_v27 = vadd.s32 4294967295, %v185_v7  ;;  %v237_v28 = vadd.s32 1, %v185_v7  ;;  %s288_s6 = sshll.u32 %s173_s5, 4  ;;  %s768_s8 = scalar_lea.hbm %s815_s2, %s393_s7  ;;  %s761_s6 = int_to_ptr.vmem [resolvable:$true] %s288_s6 }
  0x50   : > { %v257_v42 = vsub.s32 0, %v189_v8  ;;  %s275_s13 = scalar_lea.sflag [#allocation4], %s732_s28  ;;  %s504_s14 = scalar_lea.vmem %s761_s6, 512 }
  0x51   : > { %v221_v10 = vstv %s384_s23  ;;  %v195_v14 = vsub.s32 %v192_v9, %v189_v8  ;;  %vm208_vm2 = vcmp.ge.s32.totalorder %v207_v27, 0  ;;  %vm209_vm3 = vcmp.lt.s32.totalorder %v207_v27, 16  ;;  %p505_p12 = scmp.ne.s32.totalorder %s761_s6, %s504_s14  ;;  %p829_p13 = scmp.ne.s32.totalorder %s821_s21, 0 }
  0x52   : > { %182 = vadd.xlane.f32.xlu0 %v181_v5  ;;  %vm239_vm4 = vcmp.lt.s32.totalorder %v237_v28, 16  ;;  %vm210_vm5 = vmand %vm208_vm2, %vm209_vm3  ;;  %s583_s16 = smov [#allocation7]  }
  0x53   : > { %v217_v29 = vstv %s216_s30  ;;  %v246_v32 = vstv %s385_s4  ;;  %p506_p7 = pnand %p505_p12, %p829_p13  ;;  %s508_s17 = sshll.u32 %s583_s16, 4  ;;  %s509_s17 = int_to_ptr.vmem [resolvable:$false] %s508_s17 }
  0x54   : > { %s510_s3 = scalar_lea.vmem %s509_s17, 1024  ;;  %p511_p6 = scmp.lt.s32.totalorder %s761_s6, %s509_s17 }
  0x55   : > { %p507_p3 = pneg %p506_p7  ;;  %p512_p4 = scmp.lt.s32.totalorder %s510_s3, %s504_s14 }
  0x57   : > { %p513_p5 = por %p512_p4, %p511_p6 }
  0x59   : > { %p514_p0 = pnand %p513_p5, %p507_p3 }
  0xdb   : > { %v180_v11 = vpop.xlane.xlu0 %179 }
  0xdc   : > { %v222_v13 = vmul.f32 %v221_v10, %v180_v11  ;;  %v191_v17 = vrot.slane %v180_v11, %v190_v12 }
  0xde   : > { %v229_v15 = vrot.slane %v222_v13, %v190_v12 }
  0xdf   : > { %v183_v16 = vpop.xlane.xlu0 %182 }
  0xe0   : > { %v196_v18 = vrot.slane %v183_v16, %v195_v14  ;;  %v223_v19 = vmul.f32 %v221_v10, %v183_v16 }
  0xe2   : > { %v233_v20 = vrot.slane %v223_v19, %v195_v14  ;;  %v198_v21 = vsel %vm197_vm0, %v196_v18, %v191_v17 }
  0xe3   : > { %201 = vrot.lane.b32.xlu1 %v198_v21, %s580_s20 }
  0xe4   : > { %v234_v22 = vsel %vm197_vm0, %v233_v20, %v229_v15 }
 0x155   : > { %v202_v23 = vpop.permute.xlu1 %201 }
 0x156   : > { %v203_v24 = vsel %vm200_vm1, %v202_v23, %v198_v21 }
 0x157   : > { %204 = vrot.lane.b32.xlu1 %v203_v24, %s580_s20 }
 0x1c9   : > { %v205_v25 = vpop.permute.xlu1 %204 }
 0x1ca   : > { %v206_v26 = vsel %vm200_vm1, %v205_v25, %v198_v21 }
 0x1cb   : > { %241 = vrot.lane.b32.xlu1 %v206_v26, %s581_s19  ;;  %212 = vrot.lane.b32.xlu0 %v206_v26, %s582_s29 }
 0x23d   : > { %v242_v30 = vpop.permute.xlu1 %241  ;;  %v213_v31 = vpop.permute.xlu0 %212 }
 0x23e   : > { %v244_v33 = vsel %vm239_vm4, %v242_v30, 0.0  ;;  %v215_v34 = vsel %vm210_vm5, %v213_v31, 0.0 }
 0x23f   : > { %v218_v35 = vmul.f32 %v217_v29, %v215_v34  ;;  %v247_v36 = vmul.f32 %v246_v32, %v244_v33 }
 0x241   : > { %v236_v37 = vadd.f32 %v234_v22, %v218_v35 }
 0x243   : > { %v248_v38 = vadd.f32 %v247_v36, %v236_v37 }
 0x245   : > { %v386_v39 = vmul.f32 -1.442695, %v248_v38 }
 0x247   : > { %457 = vpow2.f32 %v386_v39 }
 0x251   : > { %v458_v40 = vpop.eup %457 }
 0x252   : > { %v252_v41 = vadd.f32 1.0, %v458_v40 }
 0x254   : > { %459 = vrcp.f32 %v252_v41 }
 0x25e   : > { %v460_v43 = vpop.eup %459 }
 0x25f   : > { %v258_v44 = vrot.slane %v460_v43, %v257_v42 }
 0x261   : > { %260 = vbcast.lane.b32.xlu1 %v258_v44, 256 }
 0x265   : > { %264 = vbcast.lane.b32.xlu1 %v258_v44, 264 }
 0x2d3   : > { %v261_v45 = vpop.permute.xlu1 %260 }
 0x2d4   : > { %v266_v46 = vmul.f32 %v261_v45, %v742_v0  ;;  %v267_v47 = vmul.f32 %v261_v45, %v744_v1 }
 0x2d6   : > { %270 = vst [vmem:[%s173_s5] sm:$0xff] %v266_v46  ;;  %271 = vst [vmem:[%s173_s5 + $0x8] sm:$0xff] %v267_v47 }
 0x2d7   : > { %v265_v48 = vpop.permute.xlu1 %264 }
 0x2d8   : > { %v268_v49 = vmul.f32 %v265_v48, %v746_v2  ;;  %v269_v50 = vmul.f32 %v265_v48, %v750_v4 }
 0x2da   : > { %272 = vst [vmem:[%s173_s5 + $0x10] sm:$0xff] %v268_v49  ;;  %273 = vst [vmem:[%s173_s5 + $0x18] sm:$0xff] %v269_v50 }
 0x2db   : > { %517 = shalt.err (!%p514_p0)
}
 0x2dc   : > { %s518_s25 = scalar_lea.hbm %s768_s8, 512  ;;  %s522_s19 = scalar_lea.hbm %s815_s2, 1024 }
 0x2dd   : > { %p519_p8 = scmp.ne.s32.totalorder %s768_s8, %s518_s25  ;;  %p523_p1 = scmp.lt.u32.totalorder %s768_s8, %s815_s2 }
 0x2de   : > { %p524_p2 = scmp.lt.u32.totalorder %s522_s19, %s518_s25  ;;  %p526_p12 = scmp.lt.u32.totalorder %s518_s25, %s768_s8 }
 0x2df   : > { %p520_p9 = pnand %p519_p8, %p829_p13 }
 0x2e0   : > { %p525_p11 = por %p524_p2, %p523_p1 }
 0x2e1   : > { %p521_p10 = pneg %p520_p9 }
 0x2e2   : > { %p527_p7 = por %p526_p12, %p525_p11 }
 0x2e4   : > { %p528_p3 = pnand %p527_p7, %p521_p10 }
 0x2e6   : > { %531 = shalt.err (!%p528_p3)
}
 0x2e7   : > { %s584_s4 = smov 256  }
 0x2e8   : > { %400 = dma.vmem_to_hbm [thread:$0]  (%p829_p13), %s761_s6, 512, %s768_s8, %s275_s13, %s584_s4, %s584_s4, %s580_s20  }
 0x2e9 PF: > { %s303_s5 = sand.u32 1, %s562_s9   ;;  %p830_p6 = scmp.ne.s32.totalorder %s822_s22, 0 }
 0x2ea   : > { %p831_p4 = scmp.ge.s32.totalorder %s574_s12, 2  ;;  %s304_s7 = scalar_lea.sflag [#allocation4], %s303_s5 }
 0x2ec   : > { %p411_p5 = pnand %p831_p4, %p830_p6 }
 0x2ee   : > { %557 = dma.done.wait (!%p411_p5), %s304_s7, 512  }
 0x2ef   : > { %559 = vsyncadd (!%p411_p5), %s304_s7, 4294966784  ;;  %p16_p0 = scmp.ge.s32.totalorder %s625_s15, 4   ;;  %s832_s9 = smov %s566_s10 }
 0x2f0   : > { %s833_s10 = smov %s570_s11  ;;  %s834_s11 = smov %s637_s18 }
 0x2f1   : > { %s835_s12 = smov %s625_s15  ;;  %18 = sbr.rel (!%p16_p0) target bundleno = 6 (0x6), region = 78 }
 0x2f8   :  { %309 = vsyncpa [#allocation3], 1 }
 0x2f9   :  { %311 = vsyncpa [#allocation3 + $0x1], 1 }
 0x2fa   :  { %312 = vsyncpa [#allocation4], 1 }
 0x2fb   :  { %314 = vsyncpa [#allocation4 + $0x1], 1 }
 0x2fc   :  { %315 = vsyncpa [#allocation5], 1 }
 0x2fd   :  { %317 = vsyncpa [#allocation5 + $0x1], 1 }

</bundles_post_ra>
